<compile_context>
chip_gen: v5e
topology: v5e:2x2
jax: 0.10.0
libtpu: 0.0.40
codegen_flags: <defaults>
</compile_context>

<pallas_src>
import functools

import jax
import jax.numpy as jnp
from jax import lax
from jax.experimental import pallas as pl
from jax.experimental.pallas import tpu as pltpu


def _round_up(x, m):
    return (x + m - 1) // m * m


def _dice_sums_kernel(x_ref, t_ref, inter_ref, ysum_ref, zsum_ref,
                      acc_i, acc_y, acc_z,
                      *, n_classes, ignore_index, n_valid, tile_n,
                      blocks_per_core, need_mask):
    p = pl.program_id(0)          # parallel (core) axis
    n = pl.program_id(1)          # spatial-block axis (reduction)

    @pl.when(n == 0)
    def _():
        acc_i[...] = jnp.zeros_like(acc_i)
        acc_y[...] = jnp.zeros_like(acc_y)
        acc_z[...] = jnp.zeros_like(acc_z)

    s = x_ref[...].astype(jnp.float32)               # (B, C, TN)  (bf16 inputs upcast here)
    t = t_ref[...]                                   # (B, 1, TN) int32

    mask = (t != ignore_index).astype(jnp.float32)   # (B, 1, TN)

    if need_mask:
        # Ragged tail / padded ("virtual") blocks: zero out lanes whose global
        # spatial index is >= N so they contribute nothing.
        lane = lax.broadcasted_iota(jnp.int32, (1, 1, tile_n), 2)
        gpos = (p * blocks_per_core + n) * tile_n + lane
        valid = gpos < n_valid                       # (1, 1, TN)
        mask = jnp.where(valid, mask, 0.0)
        s = jnp.where(valid, s, 0.0)

    # sum over the mask's batch axis (the "j" axis created by the reference's
    # score[B,H,W] * mask[B,1,H,W] -> (B,B,H,W) broadcast).
    msum = jnp.sum(mask, axis=0)                     # (1, TN)

    # one-hot target per class via an iota compare (tgt*tgt == tgt for one-hot)
    cid = lax.broadcasted_iota(jnp.int32, (1, n_classes, tile_n), 1)
    tgt = (t == cid).astype(jnp.float32)             # (B, C, TN)

    st = jnp.sum(s * tgt, axis=0)                    # (C, TN) = sum_b score*target
    tt = jnp.sum(tgt, axis=0)                        # (C, TN) = sum_b target^2
    ss = jnp.sum(s * s, axis=0)                      # (C, TN) = sum_b score^2

    acc_i[...] += st * msum
    acc_y[...] += tt * msum
    acc_z[...] += ss * msum

    @pl.when(n == pl.num_programs(1) - 1)
    def _():
        inter_ref[0] = jnp.sum(acc_i[...], axis=-1, keepdims=True)   # (C, 1)
        ysum_ref[0] = jnp.sum(acc_y[...], axis=-1, keepdims=True)
        zsum_ref[0] = jnp.sum(acc_z[...], axis=-1, keepdims=True)


def p_dice_loss(inputs, target, *, n_classes, ignore_index, weight=None,
                tile_n=None, max_tile_n=8192, vmem_budget_bytes=8 * 1024 * 1024):
    """Pallas equivalent of pDLoss.forward.

    inputs: (B, C, H, W) class scores (f32; bf16 also accepted and halves HBM
            traffic — accumulation is always f32).
    target: (B, 1, H, W) integer label map (ignore_index pixels are masked).
    """
    B, C, H, W = inputs.shape
    assert C == n_classes, "predict & target shape do not match"
    assert target.shape == (B, 1, H, W)
    N = H * W

    # Pure reshapes only — no wrapper-side transpose (saves a full HBM round trip).
    x = inputs.reshape(B, C, N)
    t = target.reshape(B, 1, N).astype(jnp.int32)

    # Derive the spatial tile from a VMEM budget (double-buffered inputs + f32
    # accumulators, sublane padding to 8 accounted for).  Stays well under the
    # scoped-VMEM defaults on v5e (16 MiB) and v6e/v7x (32 MiB).
    in_bytes = jnp.dtype(x.dtype).itemsize
    c_pad = _round_up(n_classes, 8)
    if tile_n is None:
        per_lane = 2 * (B * c_pad * in_bytes + B * 8 * 4) + 3 * c_pad * 4
        tile_n = min(max_tile_n, vmem_budget_bytes // per_lane)
    tile_n = max(128, (tile_n // 128) * 128)
    tile_n = min(tile_n, _round_up(N, 128))

    total_blocks = pl.cdiv(N, tile_n)
    # Shard the spatial range across the two TensorCores of a v7x chip; on
    # single-core chips the extra "parallel" axis simply runs serially.
    num_cores = 2 if total_blocks >= 2 else 1
    bpc = pl.cdiv(total_blocks, num_cores)
    need_mask = (num_cores * bpc * tile_n) != N

    if num_cores * bpc > total_blocks:
        def spatial_block(p, n):
            # clamp "virtual" padded blocks onto a real block; they are fully
            # masked out inside the kernel.
            return jnp.minimum(p * bpc + n, total_blocks - 1)
    else:
        def spatial_block(p, n):
            return p * bpc + n

    kernel = functools.partial(
        _dice_sums_kernel, n_classes=n_classes, ignore_index=ignore_index,
        n_valid=N, tile_n=tile_n, blocks_per_core=bpc, need_mask=need_mask)

    out_sd = jax.ShapeDtypeStruct((num_cores, n_classes, 1), jnp.float32)
    intersect, y_sum, z_sum = pl.pallas_call(
        kernel,
        out_shape=(out_sd, out_sd, out_sd),
        grid_spec=pltpu.PrefetchScalarGridSpec(
            num_scalar_prefetch=0,
            grid=(num_cores, bpc),
            in_specs=[
                pl.BlockSpec((B, C, tile_n), lambda p, n: (0, 0, spatial_block(p, n))),
                pl.BlockSpec((B, 1, tile_n), lambda p, n: (0, 0, spatial_block(p, n))),
            ],
            out_specs=[
                pl.BlockSpec((1, n_classes, 1), lambda p, n: (p, 0, 0)),
                pl.BlockSpec((1, n_classes, 1), lambda p, n: (p, 0, 0)),
                pl.BlockSpec((1, n_classes, 1), lambda p, n: (p, 0, 0)),
            ],
            scratch_shapes=[
                pltpu.VMEM((n_classes, tile_n), jnp.float32),
                pltpu.VMEM((n_classes, tile_n), jnp.float32),
                pltpu.VMEM((n_classes, tile_n), jnp.float32),
            ],
        ),
        compiler_params=pltpu.CompilerParams(
            dimension_semantics=("parallel", "arbitrary")),
    )(x, t)

    intersect = jnp.sum(intersect, axis=0)[:, 0]     # (C,)
    y_sum = jnp.sum(y_sum, axis=0)[:, 0]
    z_sum = jnp.sum(z_sum, axis=0)[:, 0]

    smooth = 1e-5
    dice = (2.0 * intersect + smooth) / (z_sum + y_sum + smooth)
    per_class_loss = 1.0 - dice                      # (C,)
    if weight is None:
        w = jnp.ones((n_classes,), jnp.float32)
    else:
        w = jnp.asarray(weight, jnp.float32)
    return jnp.sum(per_class_loss * w) / n_classes


def ref_p_dice_loss(inputs, target, n_classes, ignore_index, weight=None):
    """Pure-JAX line-by-line port of the PyTorch reference (incl. its broadcast)."""
    mask = jnp.where(target == ignore_index, 0.0, 1.0).astype(jnp.float32)  # (B,1,H,W)
    if weight is None:
        weight = [1.0] * n_classes
    smooth = 1e-5
    loss = 0.0
    for i in range(n_classes):
        score = inputs[:, i].astype(jnp.float32)             # (B,H,W)
        tgt = (target[:, 0] == i).astype(jnp.float32)        # (B,H,W)
        inter = jnp.sum(score * tgt * mask)                  # broadcasts to (B,B,H,W)
        y = jnp.sum(tgt * tgt * mask)
        z = jnp.sum(score * score * mask)
        d = 1.0 - (2.0 * inter + smooth) / (z + y + smooth)
        loss = loss + d * weight[i]
    return loss / n_classes


if __name__ == "__main__":
    root = jax.random.PRNGKey(0)

    def run_case(idx, B, C, H, W, ignore_index, tile_n=None, weight=None):
        k1, k2 = jax.random.split(jax.random.fold_in(root, idx))
        logits = jax.random.normal(k1, (B, C, H, W), jnp.float32)
        probs = jax.nn.softmax(logits, axis=1)                      # class scores
        # labels in {0..C} where C == ignore_index
        target = jax.random.randint(k2, (B, 1, H, W), 0, C + 1, jnp.int32)
        out = p_dice_loss(probs, target, n_classes=C, ignore_index=ignore_index,
                          weight=weight, tile_n=tile_n)
        out = jax.block_until_ready(out)
        ref = ref_p_dice_loss(probs, target, C, ignore_index, weight=weight)
        assert jnp.allclose(out, ref, rtol=1e-4, atol=1e-4), (idx, out, ref)

    # 1) default tile, N divisible by 128 -> single block, no tail masking
    run_case(0, B=2, C=4, H=16, W=16, ignore_index=4)
    # 2) ragged N (=400) -> in-kernel masking of the partial last block
    run_case(1, B=2, C=4, H=20, W=20, ignore_index=4)
    # 3) forced small tile -> two blocks sharded across the parallel core axis
    run_case(2, B=2, C=4, H=16, W=16, ignore_index=4, tile_n=128)
    # 4) odd block count -> clamped "virtual" block + ragged tail + class weights
    run_case(3, B=2, C=5, H=20, W=16, ignore_index=5, tile_n=128,
             weight=[0.5, 1.0, 1.5, 2.0, 0.25])

    print("KERNEL_OK")
</pallas_src>

<mosaic_0001>
module attributes {stable_mosaic.version = 11 : i64} {
  func.func @_dice_sums_kernel(%arg0: i32, %arg1: i32, %arg2: memref<2x4x256xf32, #tpu.memory_space<vmem>>, %arg3: memref<2x1x256xi32, #tpu.memory_space<vmem>>, %arg4: memref<1x4x1xf32, #tpu.memory_space<vmem>>, %arg5: memref<1x4x1xf32, #tpu.memory_space<vmem>>, %arg6: memref<1x4x1xf32, #tpu.memory_space<vmem>>, %arg7: memref<4x256xf32, #tpu.memory_space<vmem>>, %arg8: memref<4x256xf32, #tpu.memory_space<vmem>>, %arg9: memref<4x256xf32, #tpu.memory_space<vmem>>) attributes {dimension_semantics = [#tpu.dimension_semantics<parallel>, #tpu.dimension_semantics<arbitrary>], iteration_bounds = array<i64: 1, 1>, scalar_prefetch = 0 : i64, scratch_operands = 3 : i64, tpu.core_type = #tpu.core_type<tc>, window_params = [{transform_indices = @transform_0, window_bounds = array<i64: 2, 4, 256>}, {transform_indices = @transform_1, window_bounds = array<i64: 2, 1, 256>}, {transform_indices = @transform_2, window_bounds = array<i64: 1, 4, 1>}, {transform_indices = @transform_3, window_bounds = array<i64: 1, 4, 1>}, {transform_indices = @transform_4, window_bounds = array<i64: 1, 4, 1>}]} {
    %c0_i32 = arith.constant 0 : i32
    %0 = arith.cmpi eq, %arg1, %c0_i32 : i32
    %1 = arith.extui %0 : i1 to i32
    %c0_i32_0 = arith.constant 0 : i32
    %2 = arith.cmpi ne, %1, %c0_i32_0 : i32
    scf.if %2 {
      %cst_23 = arith.constant 0.000000e+00 : f32
      %39 = vector.broadcast %cst_23 : f32 to vector<4x256xf32>
      %c0_24 = arith.constant 0 : index
      %c0_25 = arith.constant 0 : index
      %40 = vector.load %arg7[%c0_24, %c0_25] : memref<4x256xf32, #tpu.memory_space<vmem>>, vector<4x256xf32>
      tpu.vector_store %arg7[%c0_24, %c0_25], %39 {strides = array<i32>} : memref<4x256xf32, #tpu.memory_space<vmem>>, vector<4x256xf32>,
      %cst_26 = arith.constant 0.000000e+00 : f32
      %41 = vector.broadcast %cst_26 : f32 to vector<4x256xf32>
      %c0_27 = arith.constant 0 : index
      %c0_28 = arith.constant 0 : index
      %42 = vector.load %arg8[%c0_27, %c0_28] : memref<4x256xf32, #tpu.memory_space<vmem>>, vector<4x256xf32>
      tpu.vector_store %arg8[%c0_27, %c0_28], %41 {strides = array<i32>} : memref<4x256xf32, #tpu.memory_space<vmem>>, vector<4x256xf32>,
      %cst_29 = arith.constant 0.000000e+00 : f32
      %43 = vector.broadcast %cst_29 : f32 to vector<4x256xf32>
      %c0_30 = arith.constant 0 : index
      %c0_31 = arith.constant 0 : index
      %44 = vector.load %arg9[%c0_30, %c0_31] : memref<4x256xf32, #tpu.memory_space<vmem>>, vector<4x256xf32>
      tpu.vector_store %arg9[%c0_30, %c0_31], %43 {strides = array<i32>} : memref<4x256xf32, #tpu.memory_space<vmem>>, vector<4x256xf32>,
    } else {
    }
    %c0 = arith.constant 0 : index
    %c0_1 = arith.constant 0 : index
    %c0_2 = arith.constant 0 : index
    %3 = vector.load %arg2[%c0, %c0_1, %c0_2] : memref<2x4x256xf32, #tpu.memory_space<vmem>>, vector<2x4x256xf32>
    %c0_3 = arith.constant 0 : index
    %c0_4 = arith.constant 0 : index
    %c0_5 = arith.constant 0 : index
    %4 = vector.load %arg3[%c0_3, %c0_4, %c0_5] : memref<2x1x256xi32, #tpu.memory_space<vmem>>, vector<2x1x256xi32>
    %c4_i32 = arith.constant 4 : i32
    %5 = vector.broadcast %c4_i32 : i32 to vector<2x1x256xi32>
    %6 = arith.cmpi ne, %4, %5 : vector<2x1x256xi32>
    %7 = arith.extui %6 : vector<2x1x256xi1> to vector<2x1x256xi32>
    %8 = arith.sitofp %7 : vector<2x1x256xi32> to vector<2x1x256xf32>
    %cst = arith.constant dense<0.000000e+00> : vector<1x256xf32>
    %9 = vector.multi_reduction <add>, %8, %cst [0] : vector<2x1x256xf32> to vector<1x256xf32>
    %10 = tpu.iota {dimensions = array<i32: 1>} : vector<1x4x256xi32>
    %11 = vector.broadcast %4 : vector<2x1x256xi32> to vector<2x4x256xi32>
    %12 = vector.broadcast %10 : vector<1x4x256xi32> to vector<2x4x256xi32>
    %13 = arith.cmpi eq, %11, %12 : vector<2x4x256xi32>
    %14 = arith.extui %13 : vector<2x4x256xi1> to vector<2x4x256xi32>
    %15 = arith.sitofp %14 : vector<2x4x256xi32> to vector<2x4x256xf32>
    %16 = arith.mulf %3, %15 : vector<2x4x256xf32>
    %cst_6 = arith.constant dense<0.000000e+00> : vector<4x256xf32>
    %17 = vector.multi_reduction <add>, %16, %cst_6 [0] : vector<2x4x256xf32> to vector<4x256xf32>
    %cst_7 = arith.constant dense<0.000000e+00> : vector<4x256xf32>
    %18 = vector.multi_reduction <add>, %15, %cst_7 [0] : vector<2x4x256xf32> to vector<4x256xf32>
    %19 = arith.mulf %3, %3 : vector<2x4x256xf32>
    %cst_8 = arith.constant dense<0.000000e+00> : vector<4x256xf32>
    %20 = vector.multi_reduction <add>, %19, %cst_8 [0] : vector<2x4x256xf32> to vector<4x256xf32>
    %c0_9 = arith.constant 0 : index
    %c0_10 = arith.constant 0 : index
    %21 = vector.load %arg7[%c0_9, %c0_10] : memref<4x256xf32, #tpu.memory_space<vmem>>, vector<4x256xf32>
    %22 = vector.broadcast %9 : vector<1x256xf32> to vector<4x256xf32>
    %23 = arith.mulf %17, %22 : vector<4x256xf32>
    %24 = arith.addf %21, %23 : vector<4x256xf32>
    %c0_11 = arith.constant 0 : index
    %c0_12 = arith.constant 0 : index
    %25 = vector.load %arg7[%c0_11, %c0_12] : memref<4x256xf32, #tpu.memory_space<vmem>>, vector<4x256xf32>
    tpu.vector_store %arg7[%c0_11, %c0_12], %24 {strides = array<i32>} : memref<4x256xf32, #tpu.memory_space<vmem>>, vector<4x256xf32>,
    %c0_13 = arith.constant 0 : index
    %c0_14 = arith.constant 0 : index
    %26 = vector.load %arg8[%c0_13, %c0_14] : memref<4x256xf32, #tpu.memory_space<vmem>>, vector<4x256xf32>
    %27 = vector.broadcast %9 : vector<1x256xf32> to vector<4x256xf32>
    %28 = arith.mulf %18, %27 : vector<4x256xf32>
    %29 = arith.addf %26, %28 : vector<4x256xf32>
    %c0_15 = arith.constant 0 : index
    %c0_16 = arith.constant 0 : index
    %30 = vector.load %arg8[%c0_15, %c0_16] : memref<4x256xf32, #tpu.memory_space<vmem>>, vector<4x256xf32>
    tpu.vector_store %arg8[%c0_15, %c0_16], %29 {strides = array<i32>} : memref<4x256xf32, #tpu.memory_space<vmem>>, vector<4x256xf32>,
    %c0_17 = arith.constant 0 : index
    %c0_18 = arith.constant 0 : index
    %31 = vector.load %arg9[%c0_17, %c0_18] : memref<4x256xf32, #tpu.memory_space<vmem>>, vector<4x256xf32>
    %32 = vector.broadcast %9 : vector<1x256xf32> to vector<4x256xf32>
    %33 = arith.mulf %20, %32 : vector<4x256xf32>
    %34 = arith.addf %31, %33 : vector<4x256xf32>
    %c0_19 = arith.constant 0 : index
    %c0_20 = arith.constant 0 : index
    %35 = vector.load %arg9[%c0_19, %c0_20] : memref<4x256xf32, #tpu.memory_space<vmem>>, vector<4x256xf32>
    tpu.vector_store %arg9[%c0_19, %c0_20], %34 {strides = array<i32>} : memref<4x256xf32, #tpu.memory_space<vmem>>, vector<4x256xf32>,
    %c0_i32_21 = arith.constant 0 : i32
    %36 = arith.cmpi eq, %arg1, %c0_i32_21 : i32
    %37 = arith.extui %36 : i1 to i32
    %c0_i32_22 = arith.constant 0 : i32
    %38 = arith.cmpi ne, %37, %c0_i32_22 : i32
    scf.if %38 {
      %c0_23 = arith.constant 0 : index
      %c0_24 = arith.constant 0 : index
      %39 = vector.load %arg7[%c0_23, %c0_24] : memref<4x256xf32, #tpu.memory_space<vmem>>, vector<4x256xf32>
      %cst_25 = arith.constant dense<0.000000e+00> : vector<4xf32>
      %40 = vector.multi_reduction <add>, %39, %cst_25 [1] : vector<4x256xf32> to vector<4xf32>
      %41 = vector.shape_cast %40 : vector<4xf32> to vector<4x1xf32>
      %c0_26 = arith.constant 0 : index
      %c0_27 = arith.constant 0 : index
      %c0_28 = arith.constant 0 : index
      %42 = vector.load %arg4[%c0_26, %c0_27, %c0_28] : memref<1x4x1xf32, #tpu.memory_space<vmem>>, vector<1x4x1xf32>
      %43 = vector.shape_cast %42 : vector<1x4x1xf32> to vector<4x1xf32>
      %44 = vector.shape_cast %41 : vector<4x1xf32> to vector<1x4x1xf32>
      tpu.vector_store %arg4[%c0_26, %c0_27, %c0_28], %44 {strides = array<i32>} : memref<1x4x1xf32, #tpu.memory_space<vmem>>, vector<1x4x1xf32>,
      %c0_29 = arith.constant 0 : index
      %c0_30 = arith.constant 0 : index
      %45 = vector.load %arg8[%c0_29, %c0_30] : memref<4x256xf32, #tpu.memory_space<vmem>>, vector<4x256xf32>
      %cst_31 = arith.constant dense<0.000000e+00> : vector<4xf32>
      %46 = vector.multi_reduction <add>, %45, %cst_31 [1] : vector<4x256xf32> to vector<4xf32>
      %47 = vector.shape_cast %46 : vector<4xf32> to vector<4x1xf32>
      %c0_32 = arith.constant 0 : index
      %c0_33 = arith.constant 0 : index
      %c0_34 = arith.constant 0 : index
      %48 = vector.load %arg5[%c0_32, %c0_33, %c0_34] : memref<1x4x1xf32, #tpu.memory_space<vmem>>, vector<1x4x1xf32>
      %49 = vector.shape_cast %48 : vector<1x4x1xf32> to vector<4x1xf32>
      %50 = vector.shape_cast %47 : vector<4x1xf32> to vector<1x4x1xf32>
      tpu.vector_store %arg5[%c0_32, %c0_33, %c0_34], %50 {strides = array<i32>} : memref<1x4x1xf32, #tpu.memory_space<vmem>>, vector<1x4x1xf32>,
      %c0_35 = arith.constant 0 : index
      %c0_36 = arith.constant 0 : index
      %51 = vector.load %arg9[%c0_35, %c0_36] : memref<4x256xf32, #tpu.memory_space<vmem>>, vector<4x256xf32>
      %cst_37 = arith.constant dense<0.000000e+00> : vector<4xf32>
      %52 = vector.multi_reduction <add>, %51, %cst_37 [1] : vector<4x256xf32> to vector<4xf32>
      %53 = vector.shape_cast %52 : vector<4xf32> to vector<4x1xf32>
      %c0_38 = arith.constant 0 : index
      %c0_39 = arith.constant 0 : index
      %c0_40 = arith.constant 0 : index
      %54 = vector.load %arg6[%c0_38, %c0_39, %c0_40] : memref<1x4x1xf32, #tpu.memory_space<vmem>>, vector<1x4x1xf32>
      %55 = vector.shape_cast %54 : vector<1x4x1xf32> to vector<4x1xf32>
      %56 = vector.shape_cast %53 : vector<4x1xf32> to vector<1x4x1xf32>
      tpu.vector_store %arg6[%c0_38, %c0_39, %c0_40], %56 {strides = array<i32>} : memref<1x4x1xf32, #tpu.memory_space<vmem>>, vector<1x4x1xf32>,
    } else {
    }
    return
  }
  func.func @transform_0(%arg0: i32, %arg1: i32) -> (i32, i32, i32) {
    %c1_i32 = arith.constant 1 : i32
    %0 = arith.muli %arg0, %c1_i32 : i32
    %1 = arith.addi %0, %arg1 : i32
    %c0_i32 = arith.constant 0 : i32
    %c0_i32_0 = arith.constant 0 : i32
    %c0_i32_1 = arith.constant 0 : i32
    return %c0_i32, %c0_i32_0, %1 : i32, i32, i32
  }
  func.func @transform_1(%arg0: i32, %arg1: i32) -> (i32, i32, i32) {
    %c1_i32 = arith.constant 1 : i32
    %0 = arith.muli %arg0, %c1_i32 : i32
    %1 = arith.addi %0, %arg1 : i32
    %c0_i32 = arith.constant 0 : i32
    %c0_i32_0 = arith.constant 0 : i32
    %c0_i32_1 = arith.constant 0 : i32
    return %c0_i32, %c0_i32_0, %1 : i32, i32, i32
  }
  func.func @transform_2(%arg0: i32, %arg1: i32) -> (i32, i32, i32) {
    %c0_i32 = arith.constant 0 : i32
    %c0_i32_0 = arith.constant 0 : i32
    %c0_i32_1 = arith.constant 0 : i32
    return %arg0, %c0_i32, %c0_i32_0 : i32, i32, i32
  }
  func.func @transform_3(%arg0: i32, %arg1: i32) -> (i32, i32, i32) {
    %c0_i32 = arith.constant 0 : i32
    %c0_i32_0 = arith.constant 0 : i32
    %c0_i32_1 = arith.constant 0 : i32
    return %arg0, %c0_i32, %c0_i32_0 : i32, i32, i32
  }
  func.func @transform_4(%arg0: i32, %arg1: i32) -> (i32, i32, i32) {
    %c0_i32 = arith.constant 0 : i32
    %c0_i32_0 = arith.constant 0 : i32
    %c0_i32_1 = arith.constant 0 : i32
    return %arg0, %c0_i32, %c0_i32_0 : i32, i32, i32
  }
}

</mosaic_0001>

<bundles_post_ra>
// kernel: tpu_custom_call.1
= control target key start
LH: loop header
LB: loop body
LE: loop exit
PB: predicated region body
PF: predicated region fallthrough
CT: control target
= control target key end

     0   :  { %10 = vsyncpa [#allocation6], 0  ;;  %s392_s0 = inlined_call_operand.hbm [shape: f32[2,4,256], index: 0, kind: input, shape index: {}]   ;;  %s393_s1 = inlined_call_operand.hbm [shape: s32[2,1,256], index: 1, kind: input, shape index: {}]   ;;  %s394_s2 = inlined_call_operand.vmem [shape: f32[1,4,1], index: 2, kind: output, shape index: {0}]   ;;  %s395_s3 = inlined_call_operand.vmem [shape: f32[1,4,1], index: 3, kind: output, shape index: {1}]   ;;  %s396_s4 = inlined_call_operand.vmem [shape: f32[1,4,1], index: 4, kind: output, shape index: {2}]  }
   0x1   :  { %s20_s17 = sshll.u32 %s392_s0, 4  ;;  %s21_s17 = int_to_ptr.hbm [resolvable:$true] %s20_s17 }
   0x2   :  { %11 = vsyncpa [#allocation8], 0  ;;  %s322_s18 = smov [#allocation5]   ;;  %s36_s22 = sshll.u32 %s393_s1, 4  ;;  %s37_s22 = int_to_ptr.hbm [resolvable:$true] %s36_s22 }
   0x3   :  { %s22_s19 = sshll.u32 %s322_s18, 4  ;;  %s323_s23 = smov 128   ;;  %s23_s19 = int_to_ptr.vmem [resolvable:$true] %s22_s19 }
   0x4   :  { %s324_s24 = smov 8   ;;  %s325_s25 = smov [#allocation7]  }
   0x5   :  { %28 = dma.hbm_to_vmem [thread:$0]  %s21_s17, 256, %s23_s19, [#allocation6], %s323_s23, %s323_s23, %s324_s24  }
   0x6   :  { %s38_s26 = sshll.u32 %s325_s25, 4  ;;  %s326_s27 = smov 32   ;;  %s39_s26 = int_to_ptr.vmem [resolvable:$true] %s38_s26 }
   0x7   :  { %s327_s28 = smov 2  }
   0x8   :  { %44 = dma.hbm_to_vmem [thread:$0]  %s37_s22, 64, %s39_s26, [#allocation8], %s326_s27, %s326_s27, %s327_s28  }
   0x9   :  { %318 = dma.done.wait [#allocation6], 256  }
   0xa   :  { %319 = vsyncadd [#allocation6], 4294967040 }
   0xb   :  { %320 = dma.done.wait [#allocation8], 64  }
   0xc   :  { %321 = vsyncadd [#allocation8], 4294967232  ;;  %v91_v0 = vlaneseq  ;;  %v66_v1 = vld [vmem:[#allocation7] sm:$0x3]  ;;  %v67_v3 = vld [vmem:[#allocation7 + $0x2] sm:$0x3] }
   0xd   :  { %vm68_vm0 = vcmp.ne.s32.totalorder %v66_v1, 4  ;;  %v93_v4 = vperm.slane %v66_v1, 0  ;;  %v94_v5 = vperm.slane %v66_v1, 1  ;;  %vm69_vm1 = vcmp.ne.s32.totalorder %v67_v3, 4  ;;  %v64_v16 = vld [vmem:[#allocation5] sm:$0xff]  ;;  %v65_v21 = vld [vmem:[#allocation5 + $0x8] sm:$0xff] }
   0xe   :  { %v92_v2 = vshrl.u32 %v91_v0, 7  ;;  %v95_v6 = vperm.slane %v67_v3, 0  ;;  %v96_v7 = vperm.slane %v67_v3, 1  ;;  %v328_v8 = vmov 0.0  }
   0xf   :  { %v257_v9 = vsel %vm68_vm0, 1.0, %v328_v8  ;;  %v258_v10 = vsel %vm69_vm1, 1.0, %v328_v8  ;;  %vm115_vm6 = vcmask 1043456   ;;  %vm84_vm7 = vcmask 1040384  }
  0x10   :  { %vm97_vm2 = vcmp.eq.s32.totalorder %v93_v4, %v92_v2  ;;  %vm98_vm3 = vcmp.eq.s32.totalorder %v94_v5, %v92_v2  ;;  %vm99_vm4 = vcmp.eq.s32.totalorder %v95_v6, %v92_v2  ;;  %v76_v11 = vperm.slane %v257_v9, 0 }
  0x11   :  { %vm100_vm5 = vcmp.eq.s32.totalorder %v96_v7, %v92_v2  ;;  %v77_v12 = vperm.slane %v257_v9, 1  ;;  %v78_v13 = vperm.slane %v258_v10, 0  ;;  %v259_v14 = vsel %vm97_vm2, 1.0, %v328_v8 }
  0x12   :  { %v260_v15 = vsel %vm98_vm3, 1.0, %v328_v8  ;;  %v79_v17 = vperm.slane %v258_v10, 1  ;;  %v261_v18 = vsel %vm99_vm4, 1.0, %v328_v8  ;;  %v262_v19 = vsel %vm100_vm5, 1.0, %v328_v8 }
  0x13   :  { %v113_v20 = vrot.slane %v260_v15, 4  ;;  %v114_v22 = vrot.slane %v262_v19, 4  ;;  %v85_v24 = vsel %vm84_vm7, %v76_v11, 0.0  ;;  %v86_v27 = vsel %vm84_vm7, %v78_v13, 0.0 }
  0x14   :  { %v88_v28 = vsel %vm84_vm7, %v77_v12, 0.0  ;;  %v89_v29 = vsel %vm84_vm7, %v79_v17, 0.0  ;;  %v87_v31 = vadd.f32 %v86_v27, %v85_v24  ;;  %v144_v33 = vsel %vm115_vm6, %v260_v15, 0.0 }
  0x15   :  { %v116_v23 = vsel %vm115_vm6, %v259_v14, %v113_v20  ;;  %v117_v25 = vsel %vm115_vm6, %v261_v18, %v114_v22  ;;  %v90_v32 = vadd.f32 %v89_v29, %v88_v28  ;;  %v147_v34 = vmul.f32 %v64_v16, %v64_v16 }
  0x16   :  { %v120_v26 = vmul.f32 %v116_v23, %v64_v16  ;;  %v121_v30 = vmul.f32 %v117_v25, %v65_v21  ;;  %v145_v35 = vsel %vm115_vm6, %v262_v19, 0.0  ;;  %v148_v36 = vmul.f32 %v65_v21, %v65_v21 }
  0x17   :  { %v169_v37 = vperm.slane %v87_v31, 0  ;;  %v170_v38 = vperm.slane %v90_v32, 0  ;;  %v146_v49 = vadd.f32 %v145_v35, %v144_v33  ;;  %v141_v50 = vsel %vm115_vm6, %v259_v14, 0.0 }
  0x18   :  { %124 = vst [vmem:[#allocation1] ss:$2 sm:$0xff] %v120_v26  ;;  %v142_v51 = vsel %vm115_vm6, %v261_v18, 0.0  ;;  %vm215_vm8 = vcmask 3072  }
  0x19   :  { %128 = vst [vmem:[#allocation1 + $0x10] ss:$2 sm:$0xff] %v121_v30  ;;  %v143_v55 = vadd.f32 %v142_v51, %v141_v50  ;;  %v182_v56 = vmul.f32 %v170_v38, %v146_v49 }
  0x1b   :  { %v181_v1 = vmul.f32 %v169_v37, %v143_v55  ;;  %v185_v2 = vrot.slane %v182_v56, 4 }
  0x1d   :  { %v186_v6 = vsel %vm115_vm6, %v181_v1, %v185_v2 }
  0x1f   :  { %v125_v39 = vld.sshfl [vmem:[#allocation1] sm:$0xff pattern:$0x75316420]  ;;  %v126_v40 = vld.sshfl [vmem:[#allocation1 + $0x8] sm:$0xff pattern:$0x75316420] }
  0x20   :  { %v129_v41 = vld.sshfl [vmem:[#allocation1 + $0x10] sm:$0xff pattern:$0x75316420]  ;;  %v130_v42 = vld.sshfl [vmem:[#allocation1 + $0x18] sm:$0xff pattern:$0x75316420] }
  0x21   :  { %v135_v43 = vsel %vm115_vm6, %v125_v39, 0.0  ;;  %v136_v44 = vsel %vm115_vm6, %v129_v41, 0.0  ;;  %v138_v45 = vsel %vm115_vm6, %v126_v40, 0.0  ;;  %v139_v46 = vsel %vm115_vm6, %v130_v42, 0.0  ;;  %151 = vst [vmem:[#allocation1] ss:$2 sm:$0xff] %v147_v34 }
  0x22   :  { %v137_v47 = vadd.f32 %v136_v44, %v135_v43  ;;  %v140_v48 = vadd.f32 %v139_v46, %v138_v45  ;;  %155 = vst [vmem:[#allocation1 + $0x10] ss:$2 sm:$0xff] %v148_v36 }
  0x24   :  { %v171_v52 = vmul.f32 %v169_v37, %v137_v47  ;;  %v172_v53 = vmul.f32 %v170_v38, %v140_v48 }
  0x26   :  { %v175_v54 = vrot.slane %v172_v53, 4 }
  0x28   :  { %v152_v57 = vld.sshfl [vmem:[#allocation1] sm:$0xff pattern:$0x75316420]  ;;  %v153_v58 = vld.sshfl [vmem:[#allocation1 + $0x8] sm:$0xff pattern:$0x75316420]  ;;  %v176_v59 = vsel %vm115_vm6, %v171_v52, %v175_v54 }
  0x29   :  { %v156_v60 = vld.sshfl [vmem:[#allocation1 + $0x10] sm:$0xff pattern:$0x75316420]  ;;  %v157_v61 = vld.sshfl [vmem:[#allocation1 + $0x18] sm:$0xff pattern:$0x75316420] }
  0x2a   :  { %v165_v62 = vsel %vm115_vm6, %v153_v58, 0.0  ;;  %v166_v63 = vsel %vm115_vm6, %v157_v61, 0.0  ;;  %205 = vst [vmem:[#allocation1] ss:$2 sm:$0xff] %v176_v59  ;;  %v162_v3 = vsel %vm115_vm6, %v152_v57, 0.0  ;;  %v163_v4 = vsel %vm115_vm6, %v156_v60, 0.0 }
  0x2b   :  { %v167_v0 = vadd.f32 %v166_v63, %v165_v62  ;;  %v164_v5 = vadd.f32 %v163_v4, %v162_v3 }
  0x2d   :  { %v192_v7 = vmul.f32 %v170_v38, %v167_v0  ;;  %v191_v12 = vmul.f32 %v169_v37, %v164_v5 }
  0x2f   :  { %v195_v13 = vrot.slane %v192_v7, 4 }
  0x31   :  { %v206_v8 = vld.sshfl [vmem:[#allocation1] sm:$0xff pattern:$0x75316420]  ;;  %v207_v9 = vld.sshfl [vmem:[#allocation1 + $0x8] sm:$0xff pattern:$0x75316420]  ;;  %v196_v15 = vsel %vm115_vm6, %v191_v12, %v195_v13 }
  0x32   :  { %v210_v10 = vsel %vm115_vm6, %v206_v8, 0.0  ;;  %v211_v11 = vsel %vm115_vm6, %v207_v9, 0.0  ;;  %219 = vst [vmem:[#allocation1] ss:$2 sm:$0xff] %v186_v6 }
  0x33   :  { %v212_v14 = vadd.f32 %v211_v11, %v210_v10 }
  0x35   :  { %213 = vadd.xlane.f32.xlu0 %v212_v14 }
  0x39   :  { %v220_v16 = vld.sshfl [vmem:[#allocation1] sm:$0xff pattern:$0x75316420]  ;;  %v221_v17 = vld.sshfl [vmem:[#allocation1 + $0x8] sm:$0xff pattern:$0x75316420] }
  0x3a   :  { %232 = vst [vmem:[#allocation1] ss:$2 sm:$0xff] %v196_v15  ;;  %v224_v18 = vsel %vm115_vm6, %v220_v16, 0.0  ;;  %v225_v19 = vsel %vm115_vm6, %v221_v17, 0.0 }
  0x3b   :  { %v226_v20 = vadd.f32 %v225_v19, %v224_v18 }
  0x3d   :  { %227 = vadd.xlane.f32.xlu0 %v226_v20 }
  0x41   :  { %v233_v21 = vld.sshfl [vmem:[#allocation1] sm:$0xff pattern:$0x75316420]  ;;  %v234_v22 = vld.sshfl [vmem:[#allocation1 + $0x8] sm:$0xff pattern:$0x75316420] }
  0x42   :  { %v237_v23 = vsel %vm115_vm6, %v233_v21, 0.0  ;;  %v238_v24 = vsel %vm115_vm6, %v234_v22, 0.0 }
  0x43   :  { %v239_v25 = vadd.f32 %v238_v24, %v237_v23 }
  0x45   :  { %240 = vadd.xlane.f32.xlu1 %v239_v25 }
  0xa8   :  { %v214_v26 = vpop.xlane.xlu0 %213 }
  0xa9   :  { %216 = vst.msk [vmem:[%s394_s2] sm:$0xf] %vm215_vm8, %v214_v26 }
  0xb0   :  { %v228_v27 = vpop.xlane.xlu0 %227 }
  0xb1   :  { %229 = vst.msk [vmem:[%s395_s3] sm:$0xf] %vm215_vm8, %v228_v27 }
  0xb8   :  { %v241_v28 = vpop.xlane.xlu1 %240 }
  0xb9   :  { %242 = vst.msk [vmem:[%s396_s4] sm:$0xf] %vm215_vm8, %v241_v28 }
  0xba   :  { %255 = vsyncpa [#allocation6], 1 }
  0xbb   :  { %256 = vsyncpa [#allocation8], 1 }

</bundles_post_ra>
